<compile_context>
chip_gen: v6e
topology: v6e:2x2x1
jax: 0.10.0
libtpu: 0.0.40
codegen_flags: <defaults>
</compile_context>

<pallas_src>
import jax
import jax.numpy as jnp
from jax import lax
from jax.experimental import pallas as pl
from jax.experimental.pallas import tpu as pltpu


def linear_relu_kernel(x_ref, w_ref, b_ref, o_ref):
    # x: (tm, in_f), w: (in_f, out_f) [pre-transposed, canonical (K,N)], b: (1, out_f)
    y = lax.dot_general(
        x_ref[...], w_ref[...],
        dimension_numbers=(((1,), (0,)), ((), ())),   # (M,K) x (K,N) -> (M,N)
        preferred_element_type=jnp.float32,           # f32 MXU accumulation
    )
    # Fused bias + ReLU, written straight to the (tm, out_f) output block.
    o_ref[...] = jnp.maximum(y + b_ref[...], 0.0).astype(o_ref.dtype)


def prepare_params(weight, bias):
    """One-time param prep: PyTorch (out, in) weight -> (in, out); bias -> (1, out)."""
    return weight.T, bias.reshape(1, -1)


def linear_relu(x, w_t, b_row, *, block_rows=2048):
    """x: (B, in_f), w_t: (in_f, out_f) pre-transposed, b_row: (1, out_f)."""
    B, in_f = x.shape
    in_f_w, out_f = w_t.shape
    assert in_f == in_f_w, "weight / input feature mismatch"

    # Batch tiling: big tiles to amortize per-step overhead; guarantee >= 2 grid
    # steps for moderately large B so v7x megacore shards the batch axis.
    if B <= block_rows:
        if B > 16:
            tm = max(8, ((pl.cdiv(B, 2) + 7) // 8) * 8)   # >= 2 steps, 8-sublane aligned
        else:
            tm = B                                        # tiny batch: single full block
    else:
        tm = block_rows                                   # multiple of 8 by construction
    grid = (pl.cdiv(B, tm),)

    itemsize = jnp.dtype(x.dtype).itemsize
    cost = pl.CostEstimate(
        flops=2 * B * in_f * out_f,
        transcendentals=0,
        bytes_accessed=(x.size + w_t.size + b_row.size + B * out_f) * itemsize,
    )

    return pl.pallas_call(
        linear_relu_kernel,
        out_shape=jax.ShapeDtypeStruct((B, out_f), x.dtype),
        grid=grid,
        in_specs=[
            pl.BlockSpec((tm, in_f), lambda i: (i, 0)),      # streamed activations
            pl.BlockSpec((in_f, out_f), lambda i: (0, 0)),   # VMEM-resident weight
            pl.BlockSpec((1, out_f), lambda i: (0, 0)),      # VMEM-resident bias
        ],
        out_specs=pl.BlockSpec((tm, out_f), lambda i: (i, 0)),  # direct (B, out_f) stores
        compiler_params=pltpu.CompilerParams(
            dimension_semantics=("parallel",),               # megacore sharding on v7x
        ),
        cost_estimate=cost,
    )(x, w_t, b_row)


if __name__ == "__main__":
    key = jax.random.PRNGKey(0)
    k_x, k_w, k_b = jax.random.split(key, 3)

    B, IN, OUT = 8, 50, 50
    # Deterministic parameter init mimicking torch.nn.Linear default:
    # uniform(-1/sqrt(in_features), 1/sqrt(in_features)).
    bound = 1.0 / jnp.sqrt(jnp.float32(IN))
    weight = jax.random.uniform(k_w, (OUT, IN), jnp.float32, -bound, bound)
    bias = jax.random.uniform(k_b, (OUT,), jnp.float32, -bound, bound)
    x = jax.random.normal(k_x, (B, IN), jnp.float32)

    w_t, b_row = prepare_params(weight, bias)    # one-time prep, not per call
    out = linear_relu(x, w_t, b_row)
    jax.block_until_ready(out)

    # Sanity-check against a plain-JAX reference of the same math.
    ref = jnp.maximum(x @ weight.T + bias, 0.0)
    assert out.shape == (B, OUT)
    assert jnp.allclose(out, ref, atol=1e-5, rtol=1e-5)

    print("KERNEL_OK")
</pallas_src>

<mosaic_0001>
module attributes {stable_mosaic.version = 11 : i64} {
  func.func @linear_relu_kernel(%arg0: i32, %arg1: memref<8x50xf32, #tpu.memory_space<vmem>>, %arg2: memref<50x50xf32, #tpu.memory_space<vmem>>, %arg3: memref<1x50xf32, #tpu.memory_space<vmem>>, %arg4: memref<8x50xf32, #tpu.memory_space<vmem>>) attributes {dimension_semantics = [#tpu.dimension_semantics<parallel>], iteration_bounds = array<i64: 1>, scalar_prefetch = 0 : i64, scratch_operands = 0 : i64, tpu.core_type = #tpu.core_type<tc>, window_params = [{transform_indices = @transform_0, window_bounds = array<i64: 8, 50>}, {pipeline_mode = #tpu.pipeline_mode<synchronous>, transform_indices = @transform_1, window_bounds = array<i64: 50, 50>}, {pipeline_mode = #tpu.pipeline_mode<synchronous>, transform_indices = @transform_2, window_bounds = array<i64: 1, 50>}, {transform_indices = @transform_3, window_bounds = array<i64: 8, 50>}]} {
    %c0 = arith.constant 0 : index
    %c0_0 = arith.constant 0 : index
    %0 = vector.load %arg1[%c0, %c0_0] : memref<8x50xf32, #tpu.memory_space<vmem>>, vector<8x50xf32>
    %c0_1 = arith.constant 0 : index
    %c0_2 = arith.constant 0 : index
    %1 = vector.load %arg2[%c0_1, %c0_2] : memref<50x50xf32, #tpu.memory_space<vmem>>, vector<50x50xf32>
    %cst = arith.constant dense<0.000000e+00> : vector<8x50xf32>
    %2 = tpu.matmul %0, %1, %cst {dimension_numbers = #tpu.dot_dimension_numbers<[1], [0], [0], [1], [0, 0, 1, 1], [], []>} : vector<8x50xf32>, vector<50x50xf32>, vector<8x50xf32> -> vector<8x50xf32>
    %c0_3 = arith.constant 0 : index
    %c0_4 = arith.constant 0 : index
    %3 = vector.load %arg3[%c0_3, %c0_4] : memref<1x50xf32, #tpu.memory_space<vmem>>, vector<1x50xf32>
    %4 = vector.broadcast %3 : vector<1x50xf32> to vector<8x50xf32>
    %5 = arith.addf %2, %4 : vector<8x50xf32>
    %cst_5 = arith.constant 0.000000e+00 : f32
    %6 = vector.broadcast %cst_5 : f32 to vector<8x50xf32>
    %7 = arith.maximumf %5, %6 : vector<8x50xf32>
    %c0_6 = arith.constant 0 : index
    %c0_7 = arith.constant 0 : index
    %8 = vector.load %arg4[%c0_6, %c0_7] : memref<8x50xf32, #tpu.memory_space<vmem>>, vector<8x50xf32>
    tpu.vector_store %arg4[%c0_6, %c0_7], %7 {strides = array<i32>} : memref<8x50xf32, #tpu.memory_space<vmem>>, vector<8x50xf32>,
    return
  }
  func.func @transform_0(%arg0: i32) -> (i32, i32) {
    %c0_i32 = arith.constant 0 : i32
    %c0_i32_0 = arith.constant 0 : i32
    return %arg0, %c0_i32 : i32, i32
  }
  func.func @transform_1(%arg0: i32) -> (i32, i32) {
    %c0_i32 = arith.constant 0 : i32
    %c0_i32_0 = arith.constant 0 : i32
    %c0_i32_1 = arith.constant 0 : i32
    return %c0_i32, %c0_i32_0 : i32, i32
  }
  func.func @transform_2(%arg0: i32) -> (i32, i32) {
    %c0_i32 = arith.constant 0 : i32
    %c0_i32_0 = arith.constant 0 : i32
    %c0_i32_1 = arith.constant 0 : i32
    return %c0_i32, %c0_i32_0 : i32, i32
  }
  func.func @transform_3(%arg0: i32) -> (i32, i32) {
    %c0_i32 = arith.constant 0 : i32
    %c0_i32_0 = arith.constant 0 : i32
    return %arg0, %c0_i32 : i32, i32
  }
}

</mosaic_0001>

<bundles_post_ra>
// kernel: tpu_custom_call.1
= control target key start
LH: loop header
LB: loop body
LE: loop exit
PB: predicated region body
PF: predicated region fallthrough
CT: control target
= control target key end

     0   :  { %8 = vsyncpa [#allocation3], 0  ;;  %s292_s0 = inlined_call_operand.hbm [shape: f32[8,50], index: 0, kind: input, shape index: {}]   ;;  %s293_s1 = inlined_call_operand.hbm [shape: f32[50,50], index: 1, kind: input, shape index: {}]   ;;  %s294_s2 = inlined_call_operand.vmem [shape: f32[1,50], index: 2, kind: input, shape index: {}]   ;;  %s295_s3 = inlined_call_operand.hbm [shape: f32[8,50], index: 3, kind: output, shape index: {}]  }
   0x1   :  { %9 = vsyncpa [#allocation6], 0 }
   0x2   :  { %10 = vsyncpa [#allocation4], 0  ;;  %s253_s12 = smov [#allocation2]   ;;  %s254_s14 = smov [#allocation5]  }
   0x3   :  { %s17_s13 = sshll.u32 %s253_s12, 4  ;;  %s26_s15 = sshll.u32 %s254_s14, 4  ;;  %s18_s13 = int_to_ptr.vmem [resolvable:$true] %s17_s13  ;;  %s27_s15 = int_to_ptr.vmem [resolvable:$true] %s26_s15 }
   0x4   :  { %s195_s16 = scalar_lea.vmem %s18_s13, 128  ;;  %p200_p1 = scmp.lt.s32.totalorder %s18_s13, %s18_s13 }
   0x5   :  { %p196_p0 = scmp.ne.s32.totalorder %s18_s13, %s195_s16  ;;  %p201_p2 = scmp.lt.s32.totalorder %s195_s16, %s195_s16 }
   0x7   :  { %p202_p3 = por %p201_p2, %p200_p1 }
   0x9   :  { %p203_p4 = pnand %p202_p3, %p196_p0 }
   0xb   :  { %206 = shalt.err (!%p203_p4)
}
   0xc   :  { %20 = dma.hbm_to_vmem [thread:$0]  %s292_s0, 128, %s18_s13, [#allocation3]  }
   0xd   :  { %s215_s19 = scalar_lea.vmem %s27_s15, 896  ;;  %p220_p6 = scmp.lt.s32.totalorder %s27_s15, %s27_s15 }
   0xe   :  { %p216_p5 = scmp.ne.s32.totalorder %s27_s15, %s215_s19  ;;  %p221_p7 = scmp.lt.s32.totalorder %s215_s19, %s215_s19 }
  0x10   :  { %p222_p8 = por %p221_p7, %p220_p6 }
  0x12   :  { %p223_p9 = pnand %p222_p8, %p216_p5 }
  0x14   :  { %226 = shalt.err (!%p223_p9)
}
  0x15   :  { %s255_s20 = smov 128   ;;  %s256_s21 = smov 8  }
  0x16   :  { %32 = dma.hbm_to_vmem [thread:$0]  %s293_s1, 896, %s27_s15, [#allocation6], %s255_s20, %s255_s20, %s256_s21  }
  0x17   :  { %247 = dma.done.wait [#allocation3], 128  }
  0x18   :  { %248 = vsyncadd [#allocation3], 4294967168 }
  0x19   :  { %249 = dma.done.wait [#allocation6], 896  }
  0x1a   :  { %250 = vsyncadd [#allocation6], 4294966400  ;;  %v257_v0 = vmov 0.0   ;;  %vm258_vm0 = vmmov 0   ;;  %vm60_vm1 = vcmask 1041408   ;;  %v47_v2 = vld [vmem:[#allocation5 + $0x28] sm:$0xff] }
  0x1b   :  { %163 = vmatprep.subr.mxu0 %v257_v0  ;;  %177 = vmatprep.mubr.msk.f32.mxu0 %vm258_vm0, %v257_v0  ;;  %v48_v1 = vld [vmem:[#allocation5 + $0x30] sm:$0x3]  ;;  %v46_v3 = vld [vmem:[#allocation5 + $0x20] sm:$0xff]  ;;  %v45_v4 = vld [vmem:[#allocation5 + $0x18] sm:$0xff]  ;;  %vm56_vm2 = vcmask 408576   ;;  %s259_s24 = smov [#allocation7]  }
  0x1c   :  { %164 = vmatpush3.msk.msra.mxu0 %vm60_vm1, %v48_v1  ;;  %v44_v5 = vld [vmem:[#allocation5 + $0x10] sm:$0xff]  ;;  %v43_v6 = vld [vmem:[#allocation5 + $0x8] sm:$0xff]  ;;  %v42_v7 = vld [vmem:[#allocation5] sm:$0xff]  ;;  %s142_s25 = sshll.u32 %s259_s24, 4  ;;  %s143_s25 = int_to_ptr.vmem [resolvable:$true] %s142_s25 }
  0x1d   :  { %165 = vmatprep.subr.mxu0 %v257_v0  ;;  %v41_v8 = vld [vmem:[#allocation2] sm:$0xff]  ;;  %s227_s26 = scalar_lea.vmem %s143_s25, 128  ;;  %p232_p11 = scmp.lt.s32.totalorder %s143_s25, %s143_s25 }
  0x1e   :  { %166 = vmatpush3.msra.mxu0 %v47_v2  ;;  %v152_v9 = vld [vmem:[%s294_s2] ss:$0 sm:$0xff]  ;;  %p228_p10 = scmp.ne.s32.totalorder %s143_s25, %s227_s26  ;;  %p233_p12 = scmp.lt.s32.totalorder %s227_s26, %s227_s26 }
  0x1f   :  { %167 = vmatprep.subr.mxu0 %v257_v0 }
  0x20   :  { %168 = vmatpush3.msra.mxu0 %v46_v3  ;;  %p234_p13 = por %p233_p12, %p232_p11 }
  0x21   :  { %169 = vmatprep.subr.mxu0 %v257_v0 }
  0x22   :  { %170 = vmatpush3.msra.mxu0 %v45_v4  ;;  %p235_p0 = pnand %p234_p13, %p228_p10 }
  0x23   :  { %171 = vmatprep.subr.mxu0 %v257_v0 }
  0x24   :  { %172 = vmatpush3.msra.mxu0 %v44_v5 }
  0x25   :  { %173 = vmatprep.subr.mxu0 %v257_v0 }
  0x26   :  { %174 = vmatpush3.msra.mxu0 %v43_v6 }
  0x27   :  { %175 = vmatprep.subr.mxu0 %v257_v0 }
  0x28   :  { %176 = vmatpush3.msra.mxu0 %v42_v7 }
  0x29   :  { %178 = vmatmul.mubr.msk.f32.vlgmr.msra.gmra.mxu0 %vm56_vm2, %v41_v8 }
  0xe9   :  { %v130_v10 = vpop.f32.mrf.mxu0 }
  0xea   :  { %v131_v11 = vadd.f32 %v152_v9, %v130_v10 }
  0xeb   :  { %v179_v12 = vpop.f32.mrf.mxu0 }
  0xec   :  { %v134_v13 = vmax.f32 %v131_v11, 0.0 }
  0xee   :  { %135 = vst.msk [vmem:[#allocation7] sm:$0xff] %vm56_vm2, %v134_v13 }
  0xef   :  { %238 = shalt.err (!%p235_p0)
}
  0xf0   :  { %145 = dma.vmem_to_hbm [thread:$0]  %s143_s25, 128, %s295_s3, [#allocation4]  }
  0xf1   :  { %251 = dma.done.wait [#allocation4], 128  }
  0xf2   :  { %252 = vsyncadd [#allocation4], 4294967168 }
  0xf3   :  { %149 = vsyncpa [#allocation3], 1 }
  0xf4   :  { %150 = vsyncpa [#allocation6], 1 }
  0xf5   :  { %151 = vsyncpa [#allocation4], 1 }

</bundles_post_ra>
